<compile_context>
chip_gen: v5e
topology: v5e:2x2
jax: 0.10.0
libtpu: 0.0.40
codegen_flags: <defaults>
</compile_context>

<pallas_src>
import functools
import math

import jax
import jax.numpy as jnp
from jax.experimental import pallas as pl
from jax.experimental.pallas import tpu as pltpu

DEFAULT_EPSILON = 1e-10   # small positive epsilon (module's DEFAULT_EPSILON role)
_LANES = 128
_MAX_BLOCK_ROWS = 4096    # <= 2 MiB per f32 input buffer; roofline reached well below this
_TARGET_TILES = 8         # aim for >= 8 grid steps (v7x megacore split, pipeline smoothness)


def _entropy_partial_kernel(x_ref, out_ref, *, log_input: bool, epsilon: float,
                            rows_valid: int, needs_mask: bool):
    # x_ref: (rows_per_block, 128) tile of the flattened input.
    rows_per_block = x_ref.shape[0]
    x = x_ref[...].astype(jnp.float32)

    if needs_mask:
        # The last grid block can extend past the array: Pallas edge-block
        # contents are unspecified (possibly NaN/Inf), so zero x there BEFORE
        # the log/exp.  Zeros contribute exactly 0 in both modes.
        row = jax.lax.broadcasted_iota(jnp.int32, (rows_per_block, 1), 0)
        global_row = pl.program_id(0) * rows_per_block + row
        x = jnp.where(global_row < rows_valid, x, jnp.float32(0.0))

    if log_input:
        contrib = jnp.exp(x) * x                          # exp(0) * 0 == 0 for padding
    else:
        contrib = x * jnp.log(x + jnp.float32(epsilon))   # 0 * log(eps) == 0 for padding

    # Reduce over rows only; keep the 128 lanes (lane-dense store, no per-step
    # cross-lane reduction, no scalar round trip).  Negation / base / mean
    # scaling are folded into the host-side epilogue.
    out_ref[0] = jnp.sum(contrib, axis=0, keepdims=True)


def entropy(input_, *, reduction: str = "mean", dim: int = -1,
            epsilon: float = DEFAULT_EPSILON, base=None, log_input: bool = False):
    """Pallas implementation of Entropy.forward."""
    if reduction not in ("mean", "sum"):
        # TODO(synk): reduction='none' (per-row entropy output) would need a
        # per-row output layout; not implemented here.
        raise NotImplementedError("reduction must be 'mean' or 'sum'")

    x = jnp.asarray(input_)
    n_elems = int(math.prod(x.shape))
    n_reduce = int(x.shape[dim])          # entropy-sum axis length
    n_rows = n_elems // n_reduce          # number of entropies being reduced

    itemsize = jnp.dtype(x.dtype).itemsize
    sublane = max(8, 32 // itemsize)      # 8 for f32, 16 for bf16, 32 for int8

    # ---- flatten to a lane-dense (rows_alloc, 128) slab; pad only the tiny tail
    rows_needed = pl.cdiv(n_elems, _LANES)
    rows_alloc = max(int(rows_needed), sublane)
    flat = x.reshape(-1)
    pad = rows_alloc * _LANES - n_elems
    if pad:
        # Only hit for inputs not a multiple of 128 elems or smaller than one
        # sublane group: pads < sublane*128 elems (zeros contribute exactly 0).
        flat = jnp.pad(flat, (0, pad))
    x2d = flat.reshape(rows_alloc, _LANES)

    # ---- tile sizing: small fixed cap + enough grid steps for both TCs on v7x
    rows_for_split = pl.cdiv(rows_alloc, _TARGET_TILES)
    rows_for_split = ((int(rows_for_split) + sublane - 1) // sublane) * sublane
    rows_per_block = max(sublane, min(_MAX_BLOCK_ROWS, rows_for_split))
    num_tiles = int(pl.cdiv(rows_alloc, rows_per_block))
    needs_mask = (rows_alloc % rows_per_block) != 0   # partial last block only

    kernel = functools.partial(
        _entropy_partial_kernel,
        log_input=bool(log_input),
        epsilon=float(epsilon),
        rows_valid=int(rows_alloc),
        needs_mask=bool(needs_mask),
    )

    # VMEM: 3 pipelined input buffers + f32 temporaries (upcast + contrib) + slack.
    block_bytes = rows_per_block * _LANES * itemsize
    block_f32_bytes = rows_per_block * _LANES * 4
    vmem_limit = 3 * block_bytes + 4 * block_f32_bytes + (2 << 20)
    vmem_limit = int(min(max(vmem_limit, 16 << 20), 32 << 20))

    cost = pl.CostEstimate(
        flops=3 * n_elems,
        transcendentals=n_elems,              # one log or exp per element
        bytes_accessed=n_elems * itemsize + num_tiles * _LANES * 4,
    )

    in_index_map = lambda i: (i, 0)
    in_spec = pl.BlockSpec((rows_per_block, _LANES), in_index_map)
    if num_tiles >= 3:
        try:
            in_spec = pl.BlockSpec((rows_per_block, _LANES), in_index_map,
                                   pipeline_mode=pl.Buffered(3))
        except (TypeError, AttributeError):
            pass  # older Pallas: fall back to default double buffering

    partials = pl.pallas_call(
        kernel,
        out_shape=jax.ShapeDtypeStruct((num_tiles, 1, _LANES), jnp.float32),
        grid=(num_tiles,),
        in_specs=[in_spec],
        out_specs=pl.BlockSpec((1, 1, _LANES), lambda i: (i, 0, 0)),
        compiler_params=pltpu.CompilerParams(
            dimension_semantics=("parallel",),   # per-tile partials -> both TCs on v7x
            vmem_limit_bytes=vmem_limit,
        ),
        cost_estimate=cost,
    )(x2d)

    # Fold -1, optional 1/log(base), and 1/n_rows into one scalar multiply.
    scale = -1.0
    if (not log_input) and (base is not None):
        scale /= math.log(float(base))           # log_b(x) = ln(x)/ln(b)
    if reduction == "mean":
        scale /= float(n_rows)
    return jnp.sum(partials) * jnp.float32(scale)


def _entropy_ref(x, reduction="mean", dim=-1, epsilon=DEFAULT_EPSILON,
                 base=None, log_input=False):
    """Pure-JAX reference mirroring the PyTorch module."""
    if not log_input:
        logx = jnp.log(x + epsilon)
        if base is not None:
            logx = logx / jnp.log(jnp.float32(base))
        ent = -jnp.sum(x * logx, axis=dim)
    else:
        ent = -jnp.sum(jnp.exp(x) * x, axis=dim)
    return jnp.mean(ent) if reduction == "mean" else jnp.sum(ent)


if __name__ == "__main__":
    key = jax.random.PRNGKey(0)
    k1, k2, k3, k4 = jax.random.split(key, 4)

    # Case 1: (8, 16) probability rows, default Entropy (mean, natural log).
    p1 = jax.nn.softmax(jax.random.normal(k1, (8, 16), jnp.float32), axis=-1)
    out1 = jax.block_until_ready(entropy(p1))
    ref1 = _entropy_ref(p1)
    assert jnp.allclose(out1, ref1, rtol=1e-5, atol=1e-5), (out1, ref1)

    # Case 2: ragged shape (6, 10) (exercises the tiny-tail pad), sum reduction, base 2.
    p2 = jax.nn.softmax(jax.random.normal(k2, (6, 10), jnp.float32), axis=-1)
    out2 = jax.block_until_ready(entropy(p2, reduction="sum", base=2.0))
    ref2 = _entropy_ref(p2, reduction="sum", base=2.0)
    assert jnp.allclose(out2, ref2, rtol=1e-5, atol=1e-5), (out2, ref2)

    # Case 3: log-probability input (log_input=True), mean reduction.
    lp3 = jax.nn.log_softmax(jax.random.normal(k3, (8, 16), jnp.float32), axis=-1)
    out3 = jax.block_until_ready(entropy(lp3, log_input=True))
    ref3 = _entropy_ref(lp3, log_input=True)
    assert jnp.allclose(out3, ref3, rtol=1e-5, atol=1e-5), (out3, ref3)

    # Case 4: (40, 64) -> 2560 elems (multiple of 128, no host pad), 3 grid tiles
    # with a masked partial last block (exercises the in-kernel row mask path).
    p4 = jax.nn.softmax(jax.random.normal(k4, (40, 64), jnp.float32), axis=-1)
    out4 = jax.block_until_ready(entropy(p4))
    ref4 = _entropy_ref(p4)
    assert jnp.allclose(out4, ref4, rtol=1e-5, atol=1e-5), (out4, ref4)

    print("KERNEL_OK")
</pallas_src>

<mosaic_0001>
module attributes {stable_mosaic.version = 11 : i64} {
  func.func @_entropy_partial_kernel(%arg0: i32, %arg1: memref<8x128xf32, #tpu.memory_space<vmem>>, %arg2: memref<1x1x128xf32, #tpu.memory_space<vmem>>) attributes {dimension_semantics = [#tpu.dimension_semantics<parallel>], iteration_bounds = array<i64: 1>, scalar_prefetch = 0 : i64, scratch_operands = 0 : i64, tpu.core_type = #tpu.core_type<tc>, window_params = [{transform_indices = @transform_0, window_bounds = array<i64: 8, 128>}, {transform_indices = @transform_1, window_bounds = array<i64: 1, 1, 128>}]} {
    %c0 = arith.constant 0 : index
    %c0_0 = arith.constant 0 : index
    %0 = vector.load %arg1[%c0, %c0_0] : memref<8x128xf32, #tpu.memory_space<vmem>>, vector<8x128xf32>
    %cst = arith.constant 1.000000e-10 : f32
    %1 = vector.broadcast %cst : f32 to vector<8x128xf32>
    %2 = arith.addf %0, %1 : vector<8x128xf32>
    %3 = math.log %2 : vector<8x128xf32>
    %4 = arith.mulf %0, %3 : vector<8x128xf32>
    %cst_1 = arith.constant dense<0.000000e+00> : vector<128xf32>
    %5 = vector.multi_reduction <add>, %4, %cst_1 [0] : vector<8x128xf32> to vector<128xf32>
    %6 = vector.shape_cast %5 : vector<128xf32> to vector<1x128xf32>
    %c0_2 = arith.constant 0 : index
    %c0_3 = arith.constant 0 : index
    %c0_4 = arith.constant 0 : index
    %7 = vector.load %arg2[%c0_2, %c0_3, %c0_4] : memref<1x1x128xf32, #tpu.memory_space<vmem>>, vector<1x1x128xf32>
    %8 = vector.shape_cast %7 : vector<1x1x128xf32> to vector<1x128xf32>
    %9 = vector.shape_cast %6 : vector<1x128xf32> to vector<1x1x128xf32>
    tpu.vector_store %arg2[%c0_2, %c0_3, %c0_4], %9 {strides = array<i32>} : memref<1x1x128xf32, #tpu.memory_space<vmem>>, vector<1x1x128xf32>,
    return
  }
  func.func @transform_0(%arg0: i32) -> (i32, i32) {
    %c0_i32 = arith.constant 0 : i32
    %c0_i32_0 = arith.constant 0 : i32
    return %arg0, %c0_i32 : i32, i32
  }
  func.func @transform_1(%arg0: i32) -> (i32, i32, i32) {
    %c0_i32 = arith.constant 0 : i32
    %c0_i32_0 = arith.constant 0 : i32
    %c0_i32_1 = arith.constant 0 : i32
    return %arg0, %c0_i32, %c0_i32_0 : i32, i32, i32
  }
}

</mosaic_0001>

<bundles_post_ra>
// kernel: tpu_custom_call.1
= control target key start
LH: loop header
LB: loop body
LE: loop exit
PB: predicated region body
PF: predicated region fallthrough
CT: control target
= control target key end

     0   :  { %6 = vsyncpa [#allocation3], 0  ;;  %s126_s0 = inlined_call_operand.hbm [shape: f32[8,128], index: 0, kind: input, shape index: {}]   ;;  %s127_s1 = inlined_call_operand.hbm [shape: f32[1,1,128], index: 1, kind: output, shape index: {}]  }
   0x1   :  { %7 = vsyncpa [#allocation4], 0  ;;  %s13_s8 = sshll.u32 %s126_s0, 4  ;;  %s108_s9 = smov [#allocation2]   ;;  %s14_s8 = int_to_ptr.hbm [resolvable:$true] %s13_s8 }
   0x2   :  { %s15_s10 = sshll.u32 %s108_s9, 4  ;;  %s16_s10 = int_to_ptr.vmem [resolvable:$true] %s15_s10 }
   0x3   :  { %18 = dma.hbm_to_vmem [thread:$0]  %s14_s8, 128, %s16_s10, [#allocation3]  }
   0x4   :  { %104 = dma.done.wait [#allocation3], 128  }
   0x5   :  { %105 = vsyncadd [#allocation3], 4294967168  ;;  %v23_v0 = vld [vmem:[#allocation2] sm:$0xff]  ;;  %s109_s11 = smov [#allocation5]   ;;  %s42_s14 = sshll.u32 %s127_s1, 4  ;;  %s43_s14 = int_to_ptr.hbm [resolvable:$true] %s42_s14 }
   0x6   :  { %v24_v1 = vadd.f32 1e-10, %v23_v0  ;;  %s40_s12 = sshll.u32 %s109_s11, 4  ;;  %s41_s12 = int_to_ptr.vmem [resolvable:$true] %s40_s12 }
   0x8   :  { %54 = vlog2.f32 %v24_v1 }
   0xe   :  { %v55_v2 = vpop.eup %54 }
   0xf   :  { %v26_v3 = vmul.f32 0.6931472, %v55_v2 }
  0x11   :  { %v27_v4 = vmul.f32 %v26_v3, %v23_v0 }
  0x13   :  { %v28_v5 = vrot.slane %v27_v4, 4 }
  0x15   :  { %v29_v6 = vadd.f32 %v28_v5, %v27_v4 }
  0x17   :  { %v30_v7 = vrot.slane %v29_v6, 2 }
  0x19   :  { %v31_v8 = vadd.f32 %v30_v7, %v29_v6 }
  0x1b   :  { %v32_v9 = vrot.slane %v31_v8, 1 }
  0x1d   :  { %v33_v10 = vadd.f32 %v32_v9, %v31_v8 }
  0x1f   :  { %34 = vst [vmem:[#allocation5] sm:$0x1] %v33_v10 }
  0x20   :  { %45 = dma.vmem_to_hbm [thread:$0]  %s41_s12, 16, %s43_s14, [#allocation4]  }
  0x21   :  { %106 = dma.done.wait [#allocation4], 16  }
  0x22   :  { %107 = vsyncadd [#allocation4], 4294967280 }
  0x23   :  { %50 = vsyncpa [#allocation3], 1 }
  0x24   :  { %51 = vsyncpa [#allocation4], 1 }

</bundles_post_ra>
